<compile_context>
chip_gen: v5e
topology: v5e:2x2
jax: 0.10.0
libtpu: 0.0.40
codegen_flags: <defaults>
</compile_context>

<pallas_src>
import math
from functools import partial

import jax
import jax.numpy as jnp
from jax.experimental import pallas as pl
from jax.experimental.pallas import tpu as pltpu

F32 = jnp.float32
BF16 = jnp.bfloat16

# Abramowitz & Stegun 7.1.26 erf polynomial (max abs error ~1.5e-7).
_ERF_P = 0.3275911
_ERF_A1 = 0.254829592
_ERF_A2 = -0.284496736
_ERF_A3 = 1.421413741
_ERF_A4 = -1.453152027
_ERF_A5 = 1.061405429


def _gelu_exact(x):
    """0.5*x*(1+erf(x/sqrt(2))) using exp/div only (safe Mosaic lowering)."""
    z = x * 0.7071067811865476
    az = jnp.abs(z)
    t = 1.0 / (1.0 + _ERF_P * az)
    poly = t * (_ERF_A1 + t * (_ERF_A2 + t * (_ERF_A3 + t * (_ERF_A4 + t * _ERF_A5))))
    erf_abs = 1.0 - poly * jnp.exp(-az * az)
    erf = jnp.where(z < 0.0, -erf_abs, erf_abs)
    return 0.5 * x * (1.0 + erf)


# ---------------------------------------------------------------------------
# Kernel 1: fused per-type Q/K/V projections (node-tiled, parallel grid)
# ---------------------------------------------------------------------------
def _proj_kernel(num_types, d_out, x_ref, n1h_ref, w_ref, b_ref, qkv_ref):
    x = x_ref[...].astype(BF16)                                    # [TN, Din]
    n1h = n1h_ref[...]                                             # [TN, T] f32
    # One wide MXU matmul covering every node type and Q/K/V at once.
    proj = jnp.dot(x, w_ref[...], preferred_element_type=F32) + b_ref[...]  # [TN, T*3*Dout]
    c = 3 * d_out
    acc = jnp.zeros((x.shape[0], c), F32)
    for t in range(num_types):                                     # static, small: VPU select
        acc = acc + n1h[:, t:t + 1] * proj[:, t * c:(t + 1) * c]
    qkv_ref[...] = acc.astype(BF16)                                # fused bf16 q|k|v slab


# ---------------------------------------------------------------------------
# Kernel 2: edge attention + online segment softmax + scatter-add aggregation
#   grid = (edge_split [parallel], edge_tile [arbitrary])
#   outputs per split: unnormalised acc [N,Dout], denom l [N,128], running max m [1,128],
#   plus the raw pre-softmax scores [TE,128] per tile.
# ---------------------------------------------------------------------------
def _edge_kernel(inv_scale, num_rel, d_out,
                 q_ref, kv_ref, src1h_ref, dst1h_ref, rel1h_ref,
                 relkv_ref, pri_ref, hind_ref, hexp_ref,
                 acc_ref, l_ref, m_ref, att_ref):
    e = pl.program_id(1)

    @pl.when(e == 0)
    def _():
        m_ref[...] = jnp.full_like(m_ref, -jnp.inf)
        l_ref[...] = jnp.zeros_like(l_ref)
        acc_ref[...] = jnp.zeros_like(acc_ref)

    src1h = src1h_ref[...]                                         # [TE, N] bf16 one-hot
    dst1h = dst1h_ref[...]                                         # [TE, N] bf16 one-hot
    rel1h = rel1h_ref[...].astype(F32)                             # [TE, R]

    # Gather node projections onto the edge tile (bf16 one-hot MXU matmuls, f32 acc).
    # TODO(synk): for large graphs replace these O(E*N) one-hot matmuls with a
    # PrefetchScalarGridSpec / pl.Element row-gather of q|kv by src/dst index per tile.
    q_i = jnp.dot(dst1h, q_ref[...], preferred_element_type=F32)       # [TE, Dout]
    kv_j = jnp.dot(src1h, kv_ref[...], preferred_element_type=F32)     # [TE, 2*Dout]

    # Relation transforms for K and V fused into ONE wide MXU matmul + one-hot select.
    kv_all = jnp.dot(kv_j.astype(BF16), relkv_ref[...],
                     preferred_element_type=F32)                       # [TE, R*2*Dout]
    c = 2 * d_out
    kv_t = jnp.zeros_like(kv_j)
    for r in range(num_rel):                                           # static, small: VPU select
        kv_t = kv_t + rel1h[:, r:r + 1] * kv_all[:, r * c:(r + 1) * c]
    k_t = kv_t[:, :d_out]
    v_t = kv_t[:, d_out:]

    # Per-head score via a lane-dense head-indicator matmul; [TE, 128] slab.
    score = jnp.dot((q_i * k_t).astype(BF16), hind_ref[...],
                    preferred_element_type=F32)                        # [TE, ATT_W]
    pri = pri_ref[...]                                                 # [R, ATT_W] f32
    pri_e = jnp.zeros_like(score)
    for r in range(num_rel):                                           # exact f32 VPU select
        pri_e = pri_e + rel1h[:, r:r + 1] * pri[r:r + 1, :]
    s = score * pri_e * inv_scale
    att_ref[...] = s.astype(BF16)            # raw pre-softmax scores; wrapper slices [:, :H]

    # Online (flash-style) softmax accumulation with a per-head running max.
    # TODO(synk): a true per-destination-node max would be safer for pathological score
    # ranges; the shared per-head max matches the previous formulation and is exact math.
    m_prev = m_ref[...]                                                # [1, ATT_W]
    m_new = jnp.maximum(m_prev, jnp.max(s, axis=0, keepdims=True))
    alpha = jnp.exp(m_prev - m_new)                                    # [1, ATT_W]
    p = jnp.exp(s - m_new)                                             # [TE, ATT_W] f32
    p_b = p.astype(BF16)

    hexp = hexp_ref[...]                                               # [ATT_W, Dout] bf16 0/1
    alpha_full = jnp.dot(alpha, hexp.astype(F32),
                         preferred_element_type=F32)                   # [1, Dout] (exact)
    w_full = jnp.dot(p_b, hexp, preferred_element_type=F32)            # [TE, Dout]
    msg = (v_t * w_full).astype(BF16)

    # Scatter-add to destination nodes: transpose the tile once in VMEM (no HBM dst1h_t).
    dst1h_t = dst1h.astype(F32).T.astype(BF16)                         # [N, TE]
    l_ref[...] = l_ref[...] * alpha + jnp.dot(dst1h_t, p_b,
                                              preferred_element_type=F32)
    acc_ref[...] = acc_ref[...] * alpha_full + jnp.dot(dst1h_t, msg,
                                                       preferred_element_type=F32)
    m_ref[...] = m_new


# ---------------------------------------------------------------------------
# Kernel 3: GELU -> fused per-type A-linear -> sigmoid skip mix -> LayerNorm
# (node-tiled, parallel grid; gamma/beta/skip selected in the same VPU loop)
# ---------------------------------------------------------------------------
def _update_kernel(num_types, d_out, agg_ref, x_ref, n1h_ref,
                   wa_ref, ba_ref, skip_ref, gamma_ref, beta_ref, out_ref):
    agg = agg_ref[...]                                             # [TN, Dout] f32
    x = x_ref[...]
    n1h = n1h_ref[...]
    h = _gelu_exact(agg)                                           # exact erf GELU (torch default)
    proj = jnp.dot(h.astype(BF16), wa_ref[...], preferred_element_type=F32) + ba_ref[...]
    skip = jax.nn.sigmoid(skip_ref[...])                           # [1, T]
    gamma = gamma_ref[...]                                         # [T, Dout]
    beta = beta_ref[...]
    a = jnp.zeros_like(agg)
    gamma_n = jnp.zeros_like(agg)
    beta_n = jnp.zeros_like(agg)
    s_n = jnp.zeros((agg.shape[0], 1), F32)
    for t in range(num_types):                                     # static, small: VPU select
        sel = n1h[:, t:t + 1]
        a = a + sel * proj[:, t * d_out:(t + 1) * d_out]
        gamma_n = gamma_n + sel * gamma[t:t + 1, :]
        beta_n = beta_n + sel * beta[t:t + 1, :]
        s_n = s_n + sel * skip[:, t:t + 1]
    # TODO(synk): nn.Dropout(p=0.2) is a training-time op; this forward matches eval mode.
    mix = a * s_n + x * (1.0 - s_n)
    mu = jnp.mean(mix, axis=-1, keepdims=True)
    var = jnp.mean((mix - mu) ** 2, axis=-1, keepdims=True)
    out_ref[...] = (mix - mu) * jax.lax.rsqrt(var + 1e-5) * gamma_n + beta_n


# ---------------------------------------------------------------------------
# Wrapper
# ---------------------------------------------------------------------------
def _node_tile(n, cap=512):
    """Largest multiple-of-8 tile <= cap that divides n; otherwise the full n."""
    cap = min(cap, n)
    for t in range(cap, 7, -1):
        if t % 8 == 0 and n % t == 0:
            return t
    return n


def hgt_forward(params, x, node_types, edge_index, edge_types,
                num_node_types, num_relations, heads):
    N, d_in = x.shape
    d_out = params["bq"].shape[1]
    assert d_in == d_out, "HGT skip connection requires input_dim == output_dim"
    assert d_out % heads == 0
    head_dim = d_out // heads
    inv_scale = 1.0 / math.sqrt(head_dim)
    E = edge_index.shape[1]
    T, R = num_node_types, num_relations
    src, dst = edge_index[0], edge_index[1]

    # ---- edge tiling / split geometry --------------------------------------------------
    TE = min(256, max(8, ((E + 3) // 4 + 7) // 8 * 8))              # ~E/4, mult of 8, capped
    e_pad = pl.cdiv(E, TE) * TE
    tiles = e_pad // TE
    splits = 2 if (tiles >= 2 and tiles % 2 == 0) else 1            # v7x: both TCs get edge work
    tiles_per_split = tiles // splits

    if e_pad > E:                                                   # padded edges: all-zero one-hots
        pad = e_pad - E
        src = jnp.concatenate([src, jnp.full((pad,), N, jnp.int32)])
        dst = jnp.concatenate([dst, jnp.full((pad,), N, jnp.int32)])
        edge_types = jnp.concatenate([edge_types, jnp.full((pad,), R, jnp.int32)])

    # ---- host-side prep: one-hots (exact in bf16), fused weights, relation matrices ----
    node1h = jax.nn.one_hot(node_types, T, dtype=F32)               # [N, T]
    src1h = jax.nn.one_hot(src, N, dtype=BF16)                      # [Ep, N]
    dst1h = jax.nn.one_hot(dst, N, dtype=BF16)                      # [Ep, N]
    rel1h = jax.nn.one_hot(edge_types, R, dtype=BF16)               # [Ep, R]

    w_all = jnp.concatenate([params["wq"], params["wk"], params["wv"]], axis=2)  # [T, Din, 3*Dout]
    w_all = jnp.transpose(w_all, (1, 0, 2)).reshape(d_in, T * 3 * d_out).astype(BF16)
    b_all = jnp.concatenate([params["bq"], params["bk"], params["bv"]], axis=1).reshape(1, T * 3 * d_out)
    wa_all = jnp.transpose(params["wa"], (1, 0, 2)).reshape(d_out, T * d_out).astype(BF16)
    ba_all = params["ba"].reshape(1, T * d_out)

    eye_h = jnp.eye(heads, dtype=F32)

    def block_diag(rel):  # [R, H, hd, hd] -> [R, Dout, Dout] per-head block diagonal
        return jnp.einsum("rhij,hg->rhigj", rel, eye_h).reshape(R, d_out, d_out)

    A = block_diag(params["rel_att"])
    M = block_diag(params["rel_msg"])
    z = jnp.zeros((R, d_out, d_out), F32)
    B = jnp.concatenate([jnp.concatenate([A, z], axis=2),
                         jnp.concatenate([z, M], axis=2)], axis=1)   # [R, 2Dout, 2Dout]
    rel_kv_cat = jnp.transpose(B, (1, 0, 2)).reshape(2 * d_out, R * 2 * d_out).astype(BF16)

    ATT_W = 128 * pl.cdiv(heads, 128)                               # lane-dense score width
    head_id = jnp.arange(d_out) // head_dim
    cols = jnp.arange(ATT_W)
    head_ind = (head_id[:, None] == cols[None, :]).astype(BF16)     # [Dout, ATT_W]
    head_exp = (cols[:, None] == head_id[None, :]).astype(BF16)     # [ATT_W, Dout]
    pri_wide = jnp.zeros((R, ATT_W), F32).at[:, :heads].set(params["rel_pri"])
    skip2d = params["skip"].reshape(1, T)

    TN = _node_tile(N)
    grid_n = (N // TN,)

    # ---- kernel 1: fused per-type Q/K/V projections -> bf16 q|k|v slab ------------------
    qkv = pl.pallas_call(
        partial(_proj_kernel, T, d_out),
        out_shape=jax.ShapeDtypeStruct((N, 3 * d_out), BF16),
        grid=grid_n,
        in_specs=[pl.BlockSpec((TN, d_in), lambda i: (i, 0)),
                  pl.BlockSpec((TN, T), lambda i: (i, 0)),
                  pl.BlockSpec((d_in, T * 3 * d_out), lambda i: (0, 0)),
                  pl.BlockSpec((1, T * 3 * d_out), lambda i: (0, 0))],
        out_specs=pl.BlockSpec((TN, 3 * d_out), lambda i: (i, 0)),
        compiler_params=pltpu.CompilerParams(
            dimension_semantics=("parallel",),
            vmem_limit_bytes=32 * 1024 * 1024),
    )(x, node1h, w_all, b_all)
    q_nodes = qkv[:, :d_out]                                        # [N, Dout]  bf16
    kv_nodes = qkv[:, d_out:]                                       # [N, 2*Dout] bf16

    # ---- kernel 2: edge attention + online segment softmax + aggregation ---------------
    def edge_idx(p, e):
        return (p * tiles_per_split + e, 0)

    def resident2(shape):
        return pl.BlockSpec(shape, lambda p, e: (0, 0))

    acc_part, l_part, m_part, att_pad = pl.pallas_call(
        partial(_edge_kernel, inv_scale, R, d_out),
        out_shape=(jax.ShapeDtypeStruct((splits, N, d_out), F32),
                   jax.ShapeDtypeStruct((splits, N, ATT_W), F32),
                   jax.ShapeDtypeStruct((splits, 1, ATT_W), F32),
                   jax.ShapeDtypeStruct((e_pad, ATT_W), BF16)),
        grid=(splits, tiles_per_split),
        in_specs=[resident2((N, d_out)),
                  resident2((N, 2 * d_out)),
                  pl.BlockSpec((TE, N), edge_idx),
                  pl.BlockSpec((TE, N), edge_idx),
                  pl.BlockSpec((TE, R), edge_idx),
                  resident2((2 * d_out, R * 2 * d_out)),
                  resident2((R, ATT_W)),
                  resident2((d_out, ATT_W)),
                  resident2((ATT_W, d_out))],
        out_specs=(pl.BlockSpec((None, N, d_out), lambda p, e: (p, 0, 0)),
                   pl.BlockSpec((None, N, ATT_W), lambda p, e: (p, 0, 0)),
                   pl.BlockSpec((None, 1, ATT_W), lambda p, e: (p, 0, 0)),
                   pl.BlockSpec((TE, ATT_W), edge_idx)),
        compiler_params=pltpu.CompilerParams(
            dimension_semantics=("parallel", "arbitrary"),
            # <= 48 MiB: fits under v7x's 64 MiB physical VMEM with headroom for
            # double-buffers; far below the 128 MiB on v5e/v6e.
            vmem_limit_bytes=48 * 1024 * 1024),
    )(q_nodes, kv_nodes, src1h, dst1h, rel1h,
      rel_kv_cat, pri_wide, head_ind, head_exp)

    # ---- exact combination of per-split partial softmax states (O(N*Dout) XLA work) ----
    m_g = jnp.max(m_part, axis=0, keepdims=True)                    # [1, 1, ATT_W]
    corr = jnp.exp(m_part - m_g)                                    # [splits, 1, ATT_W]
    l_tot = jnp.sum(corr * l_part, axis=0)                          # [N, ATT_W]
    corr_full = jnp.repeat(corr[:, :, :heads], head_dim, axis=2)    # [splits, 1, Dout]
    acc_tot = jnp.sum(corr_full * acc_part, axis=0)                 # [N, Dout]
    denom = jnp.repeat(l_tot[:, :heads], head_dim, axis=1)          # [N, Dout]
    agg = acc_tot / (denom + 1e-16)                                 # exact f32 normalisation

    # ---- kernel 3: node update, node-parallel grid --------------------------------------
    out = pl.pallas_call(
        partial(_update_kernel, T, d_out),
        out_shape=jax.ShapeDtypeStruct((N, d_out), F32),
        grid=grid_n,
        in_specs=[pl.BlockSpec((TN, d_out), lambda i: (i, 0)),
                  pl.BlockSpec((TN, d_in), lambda i: (i, 0)),
                  pl.BlockSpec((TN, T), lambda i: (i, 0)),
                  pl.BlockSpec((d_out, T * d_out), lambda i: (0, 0)),
                  pl.BlockSpec((1, T * d_out), lambda i: (0, 0)),
                  pl.BlockSpec((1, T), lambda i: (0, 0)),
                  pl.BlockSpec((T, d_out), lambda i: (0, 0)),
                  pl.BlockSpec((T, d_out), lambda i: (0, 0))],
        out_specs=pl.BlockSpec((TN, d_out), lambda i: (i, 0)),
        compiler_params=pltpu.CompilerParams(
            dimension_semantics=("parallel",),
            vmem_limit_bytes=32 * 1024 * 1024),
    )(agg, x, node1h, wa_all, ba_all, skip2d, params["gamma"], params["beta"])

    return out, att_pad[:E, :heads].astype(F32)


def make_params(key, d_in, d_out, num_node_types, num_relations, heads):
    head_dim = d_out // heads
    ks = jax.random.split(key, 10)

    def lin(k, shape, fan_in):
        bound = 1.0 / math.sqrt(fan_in)
        return jax.random.uniform(k, shape, jnp.float32, -bound, bound)

    glorot_bound = math.sqrt(6.0 / (head_dim + head_dim))
    return dict(
        wq=lin(ks[0], (num_node_types, d_in, d_out), d_in),
        bq=lin(ks[1], (num_node_types, d_out), d_in),
        wk=lin(ks[2], (num_node_types, d_in, d_out), d_in),
        bk=lin(ks[3], (num_node_types, d_out), d_in),
        wv=lin(ks[4], (num_node_types, d_in, d_out), d_in),
        bv=lin(ks[5], (num_node_types, d_out), d_in),
        wa=lin(ks[6], (num_node_types, d_out, d_out), d_out),
        ba=lin(ks[7], (num_node_types, d_out), d_out),
        rel_att=jax.random.uniform(ks[8], (num_relations, heads, head_dim, head_dim),
                                   jnp.float32, -glorot_bound, glorot_bound),
        rel_msg=jax.random.uniform(ks[9], (num_relations, heads, head_dim, head_dim),
                                   jnp.float32, -glorot_bound, glorot_bound),
        rel_pri=jnp.ones((num_relations, heads), jnp.float32),
        skip=jnp.ones((num_node_types,), jnp.float32),
        gamma=jnp.ones((num_node_types, d_out), jnp.float32),
        beta=jnp.zeros((num_node_types, d_out), jnp.float32),
    )


if __name__ == "__main__":
    N, D = 16, 32                 # input_dim == output_dim == 32
    T, R, H = 3, 2, 4             # node types, relations, heads (head_dim = 8)
    E = 30                        # edges (exercises edge padding + 2x2 edge grid)

    key = jax.random.PRNGKey(0)
    k_params, k_x, k_nt, k_src, k_dst, k_et = jax.random.split(key, 6)

    params = make_params(k_params, D, D, T, R, H)
    x = jax.random.normal(k_x, (N, D), jnp.float32)
    node_types = jax.random.randint(k_nt, (N,), 0, T, jnp.int32)
    edge_index = jnp.stack([jax.random.randint(k_src, (E,), 0, N, jnp.int32),
                            jax.random.randint(k_dst, (E,), 0, N, jnp.int32)], axis=0)
    edge_types = jax.random.randint(k_et, (E,), 0, R, jnp.int32)

    out, att = hgt_forward(params, x, node_types, edge_index, edge_types, T, R, H)
    out = jax.block_until_ready(out)
    att = jax.block_until_ready(att)

    assert out.shape == (N, D) and att.shape == (E, H)
    assert bool(jnp.all(jnp.isfinite(out))) and bool(jnp.all(jnp.isfinite(att)))
    print("KERNEL_OK")
</pallas_src>

<mosaic_0001>
module attributes {stable_mosaic.version = 11 : i64} {
  func.func @_proj_kernel(%arg0: i32, %arg1: memref<16x32xf32, #tpu.memory_space<vmem>>, %arg2: memref<16x3xf32, #tpu.memory_space<vmem>>, %arg3: memref<32x288xbf16, #tpu.memory_space<vmem>>, %arg4: memref<1x288xf32, #tpu.memory_space<vmem>>, %arg5: memref<16x96xbf16, #tpu.memory_space<vmem>>) attributes {dimension_semantics = [#tpu.dimension_semantics<parallel>], iteration_bounds = array<i64: 1>, scalar_prefetch = 0 : i64, scratch_operands = 0 : i64, tpu.core_type = #tpu.core_type<tc>, window_params = [{transform_indices = @transform_0, window_bounds = array<i64: 16, 32>}, {transform_indices = @transform_1, window_bounds = array<i64: 16, 3>}, {pipeline_mode = #tpu.pipeline_mode<synchronous>, transform_indices = @transform_2, window_bounds = array<i64: 32, 288>}, {pipeline_mode = #tpu.pipeline_mode<synchronous>, transform_indices = @transform_3, window_bounds = array<i64: 1, 288>}, {transform_indices = @transform_4, window_bounds = array<i64: 16, 96>}]} {
    %c0 = arith.constant 0 : index
    %c0_0 = arith.constant 0 : index
    %0 = vector.load %arg1[%c0, %c0_0] : memref<16x32xf32, #tpu.memory_space<vmem>>, vector<16x32xf32>
    %1 = arith.truncf %0 : vector<16x32xf32> to vector<16x32xbf16>
    %c0_1 = arith.constant 0 : index
    %c0_2 = arith.constant 0 : index
    %2 = vector.load %arg2[%c0_1, %c0_2] : memref<16x3xf32, #tpu.memory_space<vmem>>, vector<16x3xf32>
    %c0_3 = arith.constant 0 : index
    %c0_4 = arith.constant 0 : index
    %3 = vector.load %arg3[%c0_3, %c0_4] : memref<32x288xbf16, #tpu.memory_space<vmem>>, vector<32x288xbf16>
    %cst = arith.constant dense<0.000000e+00> : vector<16x288xf32>
    %4 = tpu.matmul %1, %3, %cst {dimension_numbers = #tpu.dot_dimension_numbers<[1], [0], [0], [1], [0, 0, 1, 1], [], []>} : vector<16x32xbf16>, vector<32x288xbf16>, vector<16x288xf32> -> vector<16x288xf32>
    %c0_5 = arith.constant 0 : index
    %c0_6 = arith.constant 0 : index
    %5 = vector.load %arg4[%c0_5, %c0_6] : memref<1x288xf32, #tpu.memory_space<vmem>>, vector<1x288xf32>
    %6 = vector.broadcast %5 : vector<1x288xf32> to vector<16x288xf32>
    %7 = arith.addf %4, %6 : vector<16x288xf32>
    %cst_7 = arith.constant 0.000000e+00 : f32
    %8 = vector.broadcast %cst_7 : f32 to vector<16x96xf32>
    %9 = vector.extract_strided_slice %2 {offsets = [0, 0], sizes = [16, 1], strides = [1, 1]} : vector<16x3xf32> to vector<16x1xf32>
    %10 = vector.extract_strided_slice %7 {offsets = [0, 0], sizes = [16, 96], strides = [1, 1]} : vector<16x288xf32> to vector<16x96xf32>
    %11 = vector.broadcast %9 : vector<16x1xf32> to vector<16x96xf32>
    %12 = arith.mulf %11, %10 : vector<16x96xf32>
    %13 = arith.addf %8, %12 : vector<16x96xf32>
    %14 = vector.extract_strided_slice %2 {offsets = [0, 1], sizes = [16, 1], strides = [1, 1]} : vector<16x3xf32> to vector<16x1xf32>
    %15 = vector.extract_strided_slice %7 {offsets = [0, 96], sizes = [16, 96], strides = [1, 1]} : vector<16x288xf32> to vector<16x96xf32>
    %16 = vector.broadcast %14 : vector<16x1xf32> to vector<16x96xf32>
    %17 = arith.mulf %16, %15 : vector<16x96xf32>
    %18 = arith.addf %13, %17 : vector<16x96xf32>
    %19 = vector.extract_strided_slice %2 {offsets = [0, 2], sizes = [16, 1], strides = [1, 1]} : vector<16x3xf32> to vector<16x1xf32>
    %20 = vector.extract_strided_slice %7 {offsets = [0, 192], sizes = [16, 96], strides = [1, 1]} : vector<16x288xf32> to vector<16x96xf32>
    %21 = vector.broadcast %19 : vector<16x1xf32> to vector<16x96xf32>
    %22 = arith.mulf %21, %20 : vector<16x96xf32>
    %23 = arith.addf %18, %22 : vector<16x96xf32>
    %24 = arith.truncf %23 : vector<16x96xf32> to vector<16x96xbf16>
    %c0_8 = arith.constant 0 : index
    %c0_9 = arith.constant 0 : index
    %25 = vector.load %arg5[%c0_8, %c0_9] : memref<16x96xbf16, #tpu.memory_space<vmem>>, vector<16x96xbf16>
    tpu.vector_store %arg5[%c0_8, %c0_9], %24 {strides = array<i32>} : memref<16x96xbf16, #tpu.memory_space<vmem>>, vector<16x96xbf16>,
    return
  }
  func.func @transform_0(%arg0: i32) -> (i32, i32) {
    %c0_i32 = arith.constant 0 : i32
    %c0_i32_0 = arith.constant 0 : i32
    return %arg0, %c0_i32 : i32, i32
  }
  func.func @transform_1(%arg0: i32) -> (i32, i32) {
    %c0_i32 = arith.constant 0 : i32
    %c0_i32_0 = arith.constant 0 : i32
    return %arg0, %c0_i32 : i32, i32
  }
  func.func @transform_2(%arg0: i32) -> (i32, i32) {
    %c0_i32 = arith.constant 0 : i32
    %c0_i32_0 = arith.constant 0 : i32
    %c0_i32_1 = arith.constant 0 : i32
    return %c0_i32, %c0_i32_0 : i32, i32
  }
  func.func @transform_3(%arg0: i32) -> (i32, i32) {
    %c0_i32 = arith.constant 0 : i32
    %c0_i32_0 = arith.constant 0 : i32
    %c0_i32_1 = arith.constant 0 : i32
    return %c0_i32, %c0_i32_0 : i32, i32
  }
  func.func @transform_4(%arg0: i32) -> (i32, i32) {
    %c0_i32 = arith.constant 0 : i32
    %c0_i32_0 = arith.constant 0 : i32
    return %arg0, %c0_i32 : i32, i32
  }
}

</mosaic_0001>

<bundles_post_ra>
// kernel: tpu_custom_call.1
= control target key start
LH: loop header
LB: loop body
LE: loop exit
PB: predicated region body
PF: predicated region fallthrough
CT: control target
= control target key end

     0   :  { %9 = vsyncpa [#allocation3], 0  ;;  %s403_s0 = inlined_call_operand.vmem [shape: f32[16,32], index: 0, kind: input, shape index: {}]   ;;  %s404_s1 = inlined_call_operand.vmem [shape: f32[16,3], index: 1, kind: input, shape index: {}]   ;;  %s405_s2 = inlined_call_operand.hbm [shape: bf16[32,288], index: 2, kind: input, shape index: {}]   ;;  %s406_s3 = inlined_call_operand.vmem [shape: f32[1,288], index: 3, kind: input, shape index: {}]   ;;  %s407_s4 = inlined_call_operand.hbm [shape: bf16[16,96], index: 4, kind: output, shape index: {}]  }
   0x1   :  { %10 = vsyncpa [#allocation4], 0  ;;  %s19_s17 = sshll.u32 %s405_s2, 4  ;;  %s332_s18 = smov [#allocation2]   ;;  %s20_s17 = int_to_ptr.hbm [resolvable:$true] %s19_s17 }
   0x2   :  { %s21_s19 = sshll.u32 %s332_s18, 4  ;;  %s333_s20 = smov 192   ;;  %s22_s19 = int_to_ptr.vmem [resolvable:$true] %s21_s19 }
   0x3   :  { %s334_s21 = smov 12  }
   0x4   :  { %27 = dma.hbm_to_vmem [thread:$0]  %s20_s17, 768, %s22_s19, [#allocation3], %s333_s20, %s333_s20, %s334_s21  }
   0x5   :  { %328 = dma.done.wait [#allocation3], 768  }
   0x6   :  { %329 = vsyncadd [#allocation3], 4294966528  ;;  %v335_v0 = vmov 1   ;;  %v336_v1 = vmov 2   ;;  %v337_v2 = vmov 0   ;;  %v35_v21 = vld [vmem:[%s403_s0] sm:$0xff] }
   0x7   :  { %276 = vset.pattern.permute.xlu0 %v335_v0  ;;  %277 = vset.pattern.permute.xlu1 %v336_v1  ;;  %v247_v3 = vld [vmem:[#allocation2 + $0x18] sm:$0xf]  ;;  %v264_v4 = vld [vmem:[#allocation2 + $0x20] sm:$0xf0]  ;;  %v263_v5 = vld [vmem:[#allocation2 + $0x1c] sm:$0xf] }
   0x8   :  { %278 = vset.pattern.permute.xlu2 %v337_v2  ;;  %v248_v6 = vor.u32 %v264_v4, %v247_v3  ;;  %v249_v7 = vld [vmem:[#allocation2 + $0x24] sm:$0xf0]  ;;  %v255_v8 = vld [vmem:[#allocation2 + $0x20] sm:$0xf]  ;;  %v265_v9 = vld [vmem:[#allocation2 + $0x28] sm:$0xf0] }
   0x9   :  { %v252_v10 = vor.u32 %v263_v5, %v249_v7  ;;  %v256_v11 = vor.u32 %v265_v9, %v255_v8  ;;  %v235_v12 = vld [vmem:[#allocation2] sm:$0xf]  ;;  %v261_v13 = vld [vmem:[#allocation2 + $0x8] sm:$0xf0]  ;;  %v260_v14 = vld [vmem:[#allocation2 + $0x4] sm:$0xf] }
   0xa   :  { %98 = vmatpush.bf16.msra.mxu0 %v248_v6  ;;  %v236_v15 = vor.u32 %v261_v13, %v235_v12  ;;  %v237_v16 = vld [vmem:[#allocation2 + $0xc] sm:$0xf0]  ;;  %v243_v17 = vld [vmem:[#allocation2 + $0x8] sm:$0xf]  ;;  %v262_v18 = vld [vmem:[#allocation2 + $0x10] sm:$0xf0] }
   0xb   :  { %112 = vmatpush.bf16.msra.mxu1 %v252_v10  ;;  %126 = vmatpush.bf16.msra.mxu2 %v256_v11  ;;  %v240_v19 = vor.u32 %v260_v14, %v237_v16  ;;  %v244_v20 = vor.u32 %v262_v18, %v243_v17  ;;  %v36_v22 = vld [vmem:[%s403_s0 + $0x8] sm:$0xff]  ;;  %v38_v23 = vld [vmem:[%s404_s1] sm:$0xff]  ;;  %vm88_vm0 = vcmask 261120   ;;  %vm202_vm1 = vcmask 523264   ;;  %s340_s30 = smov [#allocation5]   ;;  %s220_s8 = sshll.u32 %s407_s4, 4  ;;  %s221_s8 = int_to_ptr.hbm [resolvable:$true] %s220_s8 }
   0xc   :  { %149 = vperm.xlu0 %276, %v38_v23   ;;  %179 = vperm.xlu1 %277, %v38_v23   ;;  %v37_v24 = vpack.c.bf16 %v36_v22, %v35_v21  ;;  %v39_v25 = vld [vmem:[%s404_s1 + $0x8] sm:$0xff]  ;;  %v48_v26 = vld [vmem:[%s406_s3] sm:$0x7]  ;;  %s338_s1 = smov 32   ;;  %s339_s3 = smov 64   ;;  %vm211_vm2 = vcmask 781312  }
   0xd   :  { %136 = vperm.xlu2 %278, %v38_v23   ;;  %v50_v27 = vperm.slane %v48_v26, 0  ;;  %v51_v28 = vperm.slane %v48_v26, 1  ;;  %v52_v43 = vperm.slane %v48_v26, 2  ;;  %s218_s5 = sshll.u32 %s340_s30, 4  ;;  %s341_s9 = smov 4   ;;  %s219_s5 = int_to_ptr.vmem [resolvable:$true] %s218_s5 }
   0xe   :  { %99 = vmatpush.bf16.msra.mxu0 %v236_v15 }
   0xf   :  { %113 = vmatpush.bf16.msra.mxu1 %v240_v19  ;;  %127 = vmatpush.bf16.msra.mxu2 %v244_v20 }
  0x11   :  { %257 = vmatmul.msk.bf16.vlgmr.msra.gmra.mxu0 %vm88_vm0, %v37_v24 }
  0x12   :  { %258 = vmatmul.msk.bf16.vlgmr.msra.gmra.mxu1 %vm88_vm0, %v37_v24  ;;  %259 = vmatmul.msk.bf16.vlgmr.msra.gmra.mxu2 %vm88_vm0, %v37_v24 }
  0x14   :  { %153 = vperm.xlu0 %276, %v39_v25   ;;  %183 = vperm.xlu1 %277, %v39_v25  }
  0x15   :  { %141 = vperm.xlu2 %278, %v39_v25  }
  0x1c   :  { %279 = vset.pattern.permute.xlu0 %v336_v1 }
  0x67   :  { %v137_v54 = vpop.permute.xlu2 %136 }
  0x6f   :  { %v142_v55 = vpop.permute.xlu2 %141 }
  0x7e   :  { %v150_v29 = vpop.permute.xlu0 %149  ;;  %v180_v36 = vpop.permute.xlu1 %179 }
  0x86   :  { %v154_v41 = vpop.permute.xlu0 %153  ;;  %v184_v50 = vpop.permute.xlu1 %183 }
  0x8e   :  { %v101_v30 = vpop.f32.mrf.mxu0 }
  0x8f   :  { %v102_v31 = vadd.f32 %v101_v30, %v50_v27  ;;  %v115_v32 = vpop.f32.mrf.mxu1 }
  0x90   :  { %v116_v33 = vadd.f32 %v115_v32, %v51_v28 }
  0x91   :  { %v156_v34 = vmul.f32 %v150_v29, %v102_v31  ;;  %v144_v60 = vmul.f32 %v137_v54, %v102_v31 }
  0x92   :  { %v157_v35 = vmul.f32 %v150_v29, %v116_v33  ;;  %v186_v45 = vmul.f32 %v180_v36, %v116_v33 }
  0x93   :  { %164 = vrot.lane.b32.xlu0 %v156_v34, %s338_s1 }
  0x94   :  { %166 = vrot.lane.b32.xlu1 %v157_v35, %s338_s1 }
  0x95   :  { %v129_v37 = vpop.f32.mrf.mxu2 }
  0x96   :  { %v103_v38 = vpop.f32.mrf.mxu0  ;;  %v130_v47 = vadd.f32 %v129_v37, %v52_v43 }
  0x97   :  { %v104_v39 = vadd.f32 %v103_v38, %v50_v27  ;;  %v117_v40 = vpop.f32.mrf.mxu1 }
  0x98   :  { %v118_v42 = vadd.f32 %v117_v40, %v51_v28  ;;  %v187_v51 = vmul.f32 %v180_v36, %v130_v47 }
  0x99   :  { %v158_v44 = vmul.f32 %v154_v41, %v104_v39  ;;  %v145_v5 = vmul.f32 %v142_v55, %v104_v39 }
  0x9a   :  { %v159_v46 = vmul.f32 %v154_v41, %v118_v42  ;;  %v188_v52 = vmul.f32 %v184_v50, %v118_v42 }
  0x9b   :  { %168 = vrot.lane.b32.xlu2 %v158_v44, %s338_s1 }
  0x9c   :  { %194 = vrot.lane.b32.xlu1 %v186_v45, %s339_s3  ;;  %170 = vrot.lane.b32.xlu0 %v159_v46, %s338_s1 }
  0x9d   :  { %v131_v48 = vpop.f32.mrf.mxu2 }
  0x9e   :  { %v132_v49 = vadd.f32 %v131_v48, %v52_v43 }
  0xa0   :  { %v189_v53 = vmul.f32 %v184_v50, %v132_v49 }
  0xa3   :  { %196 = vrot.lane.b32.xlu2 %v187_v51, %s339_s3 }
  0xa4   :  { %200 = vrot.lane.b32.xlu1 %v189_v53, %s339_s3  ;;  %198 = vrot.lane.b32.xlu0 %v188_v52, %s339_s3 }
  0xf5   :  { %v169_v56 = vpop.permute.xlu2 %168 }
  0xfd   :  { %v197_v61 = vpop.permute.xlu2 %196 }
 0x105   :  { %v165_v57 = vpop.permute.xlu0 %164 }
 0x106   :  { %v167_v58 = vpop.permute.xlu1 %166 }
 0x107   :  { %v172_v59 = vsel %vm88_vm0, %v165_v57, %v167_v58 }
 0x108   :  { %v176_v62 = vadd.f32 %v172_v59, %v144_v60 }
 0x10e   :  { %v195_v63 = vpop.permute.xlu1 %194  ;;  %v171_v0 = vpop.permute.xlu0 %170 }
 0x10f   :  { %v203_v1 = vsel %vm202_vm1, %v195_v63, %v197_v61  ;;  %v173_v4 = vsel %vm88_vm0, %v169_v56, %v171_v0 }
 0x110   :  { %v207_v2 = vadd.f32 %v203_v1, %v176_v62  ;;  %v177_v6 = vadd.f32 %v173_v4, %v145_v5 }
 0x112   :  { %v209_v3 = vpack.c.bf16 %v207_v2, %v207_v2 }
 0x114   :  { %212 = vst.msk [vmem:[#allocation5] sm:$0xf] %vm211_vm2, %v209_v3 }
 0x116   :  { %v201_v7 = vpop.permute.xlu1 %200  ;;  %v199_v8 = vpop.permute.xlu0 %198 }
 0x117   :  { %v204_v9 = vsel %vm202_vm1, %v199_v8, %v201_v7 }
 0x118   :  { %v208_v10 = vadd.f32 %v204_v9, %v177_v6 }
 0x11a   :  { %v210_v11 = vpack.c.bf16 %v208_v10, %v208_v10 }
 0x11c   :  { %213 = vst.msk [vmem:[#allocation5 + $0x4] sm:$0xf] %vm211_vm2, %v210_v11 }
 0x11d   :  { %226 = dma.vmem_to_hbm [thread:$0]  %s219_s5, 128, %s221_s8, [#allocation4], %s339_s3, %s339_s3, %s341_s9  }
 0x11e   :  { %330 = dma.done.wait [#allocation4], 128  }
 0x11f   :  { %331 = vsyncadd [#allocation4], 4294967168 }
 0x120   :  { %231 = vsyncpa [#allocation3], 1 }
 0x121   :  { %232 = vsyncpa [#allocation4], 1 }

</bundles_post_ra>
